<compile_context>
chip_gen: v7x
topology: tpu7x:2x2x1
jax: 0.10.0
libtpu: 0.0.40
codegen_flags: <defaults>
</compile_context>

<pallas_src>
import jax
import jax.numpy as jnp
from jax.experimental import pallas as pl
from jax.experimental.pallas import tpu as pltpu

_LANE = 128


def _copy2d_kernel(x_ref, o_ref):
    # Pure pass-through of one (tile_rows, lane_cols) lane-dense tile.
    o_ref[...] = x_ref[...]


def _sublane_unit(itemsize):
    # Minimum legal sublane multiple per dtype width:
    #   f32 -> 8, bf16/fp16 -> 16, int8/fp8 -> 32.
    return 8 * max(1, 4 // int(itemsize))


def _pick_lane_cols(total, max_lane_cols=1024):
    """Largest multiple of 128 (<= cap) that divides `total` exactly.

    Exact division means no padding and no trailing slice are needed, so the
    copy moves exactly 2N bytes of HBM traffic.
    """
    c = min(max_lane_cols, (total // _LANE) * _LANE)
    while c >= _LANE:
        if total % c == 0:
            return c
        c -= _LANE
    return None


def _pick_tile_rows(rows, lane_cols, itemsize, sub):
    TARGET_BLOCK_BYTES = 8 * 1024 * 1024  # footprint ~4x with double buffering
    MIN_GRID_STEPS = 8                    # keep both v7x TCs' DMA engines busy
    if rows <= sub:
        return rows  # block equals the full dim -> always a legal tile
    tile_rows = TARGET_BLOCK_BYTES // (lane_cols * itemsize)
    tile_rows = max(sub, (tile_rows // sub) * sub)
    # Keep at least MIN_GRID_STEPS sequential/parallel grid iterations when
    # the data is large enough (on single-TC v5e/v6e this is a no-op).
    cap = (rows + MIN_GRID_STEPS - 1) // MIN_GRID_STEPS
    cap = max(sub, ((cap + sub - 1) // sub) * sub)
    tile_rows = min(tile_rows, cap)
    return min(tile_rows, rows)


def _materialized_copy(x, donate=False):
    """Tiled, lane-dense HBM->VMEM->HBM identity copy of x via Pallas."""
    total = int(x.size)
    itemsize = int(jnp.dtype(x.dtype).itemsize)
    sub = _sublane_unit(itemsize)

    lane_cols = _pick_lane_cols(total)
    if lane_cols is None:
        # Rare case: element count not a multiple of 128.
        # TODO(synk): handle the sub-128 tail with dynamic_update_slice instead
        # of this pad + slice round trip.
        flat = x.reshape(-1)
        padded = ((total + _LANE - 1) // _LANE) * _LANE
        flat = jnp.pad(flat, (0, padded - total))
        lane_cols = _LANE
        rows = padded // lane_cols
        x2 = flat.reshape(rows, lane_cols)
        needs_slice = True
    else:
        rows = total // lane_cols
        x2 = x.reshape(rows, lane_cols)  # free for contiguous NCHW
        needs_slice = False

    tile_rows = _pick_tile_rows(rows, lane_cols, itemsize, sub)
    tile_bytes = tile_rows * lane_cols * itemsize
    # ~4x tile for 2-deep in + out double buffering plus headroom; floor at
    # 32 MiB, cap at 48 MiB so it also fits v7x's 64 MiB-per-TC VMEM.
    vmem_limit = min(48 * 1024 * 1024,
                     max(32 * 1024 * 1024, 4 * tile_bytes + 8 * 1024 * 1024))

    grid = (pl.cdiv(rows, tile_rows),)
    out2 = pl.pallas_call(
        _copy2d_kernel,
        out_shape=jax.ShapeDtypeStruct((rows, lane_cols), x.dtype),
        grid=grid,
        in_specs=[pl.BlockSpec((tile_rows, lane_cols), lambda i: (i, 0))],
        out_specs=pl.BlockSpec((tile_rows, lane_cols), lambda i: (i, 0)),
        compiler_params=pltpu.CompilerParams(
            dimension_semantics=("parallel",),
            vmem_limit_bytes=vmem_limit),
        cost_estimate=pl.CostEstimate(
            flops=0,
            transcendentals=0,
            bytes_accessed=2 * rows * lane_cols * itemsize),
        input_output_aliases=({0: 0} if donate else {}),
    )(x2)

    if needs_slice:
        return out2.reshape(-1)[:total].reshape(x.shape)
    return out2.reshape(x.shape)


def attn_unet_v5_2_forward(x, materialize=False, donate=False):
    """Pallas equivalent of AttnUnetV5_2.forward.

    Args:
      x: jnp.ndarray of shape (N, C, H, W).
      materialize: if False (default, optimal), the identity is returned with
        no kernel launch and zero HBM traffic.  If True, a distinct output
        buffer is produced by a lane-dense tiled Pallas copy kernel.
      donate: with materialize=True, alias input and output buffers
        (input_output_aliases={0: 0}) when the caller can donate the input.

    Returns:
      dict with key 'x_recon'.
    """
    if not materialize:
        # nn.Identity: strictly faster than any copy kernel on every TPU gen.
        return {"x_recon": x}
    return {"x_recon": _materialized_copy(x, donate=donate)}


if __name__ == "__main__":
    # Deterministic example input, NCHW: batch=2, channels=4, spatial=16x16.
    key = jax.random.PRNGKey(0)
    x = jax.random.normal(key, (2, 4, 16, 16), dtype=jnp.float32)

    # Fast (default) path: pure identity, no kernel.
    out_fast = attn_unet_v5_2_forward(x)
    assert out_fast["x_recon"] is x

    # Materialized path: exercises the Pallas copy kernel (f32).
    out = attn_unet_v5_2_forward(x, materialize=True)
    x_recon = jax.block_until_ready(out["x_recon"])
    assert x_recon.shape == x.shape
    assert x_recon.dtype == x.dtype
    assert bool(jnp.all(x_recon == x))

    # bf16 coverage (dtype-aware sublane rounding path).
    xb = x.astype(jnp.bfloat16)
    outb = attn_unet_v5_2_forward(xb, materialize=True)
    xb_recon = jax.block_until_ready(outb["x_recon"])
    assert xb_recon.shape == xb.shape
    assert xb_recon.dtype == xb.dtype
    assert bool(jnp.all(xb_recon == xb))

    print("KERNEL_OK")
</pallas_src>

<mosaic_0001>
module attributes {stable_mosaic.version = 11 : i64} {
  func.func @_copy2d_kernel(%arg0: i32, %arg1: memref<2x1024xf32, #tpu.memory_space<vmem>>, %arg2: memref<2x1024xf32, #tpu.memory_space<vmem>>) attributes {dimension_semantics = [#tpu.dimension_semantics<parallel>], iteration_bounds = array<i64: 1>, scalar_prefetch = 0 : i64, scratch_operands = 0 : i64, tpu.core_type = #tpu.core_type<tc>, window_params = [{transform_indices = @transform_0, window_bounds = array<i64: 2, 1024>}, {transform_indices = @transform_1, window_bounds = array<i64: 2, 1024>}]} {
    %c0 = arith.constant 0 : index
    %c0_0 = arith.constant 0 : index
    %0 = vector.load %arg1[%c0, %c0_0] : memref<2x1024xf32, #tpu.memory_space<vmem>>, vector<2x1024xf32>
    %c0_1 = arith.constant 0 : index
    %c0_2 = arith.constant 0 : index
    %1 = vector.load %arg2[%c0_1, %c0_2] : memref<2x1024xf32, #tpu.memory_space<vmem>>, vector<2x1024xf32>
    tpu.vector_store %arg2[%c0_1, %c0_2], %0 {strides = array<i32>} : memref<2x1024xf32, #tpu.memory_space<vmem>>, vector<2x1024xf32>,
    return
  }
  func.func @transform_0(%arg0: i32) -> (i32, i32) {
    %c0_i32 = arith.constant 0 : i32
    %c0_i32_0 = arith.constant 0 : i32
    return %arg0, %c0_i32 : i32, i32
  }
  func.func @transform_1(%arg0: i32) -> (i32, i32) {
    %c0_i32 = arith.constant 0 : i32
    %c0_i32_0 = arith.constant 0 : i32
    return %arg0, %c0_i32 : i32, i32
  }
}

</mosaic_0001>

<bundles_post_ra>
// kernel: tpu_custom_call.1
= control target key start
LH: loop header
LB: loop body
LE: loop exit
PB: predicated region body
PF: predicated region fallthrough
CT: control target
= control target key end

     0   :  { %6 = vsyncpa [#allocation3], 0  ;;  %s126_s0 = inlined_call_operand.hbm [shape: f32[2,1024], index: 0, kind: input, shape index: {}]   ;;  %s127_s1 = inlined_call_operand.hbm [shape: f32[2,1024], index: 1, kind: output, shape index: {}]  }
   0x1   :  { %7 = vsyncpa [#allocation4], 0  ;;  %s90_s6 = smov [#allocation2]   ;;  %s42_s10 = scalar_lea.hbm %s126_s0, 256 }
   0x2   :  { %s14_s7 = sshll.u32 %s90_s6, 4  ;;  %p43_p0 = scmp.ne.s32.totalorder %s126_s0, %s42_s10  ;;  %s15_s7 = int_to_ptr.vmem [resolvable:$true] %s14_s7 }
   0x3   :  { %p46_p1 = scmp.lt.u32.totalorder %s42_s10, %s126_s0 }
   0x5   :  { %p48_p2 = pnand %p46_p1, %p43_p0 }
   0x7   :  { %51 = shalt.err (!%p48_p2)
}
   0x8   :  { %s52_s15 = scalar_lea.vmem %s15_s7, 256  ;;  %p57_p4 = scmp.lt.s32.totalorder %s15_s7, %s15_s7 }
   0x9   :  { %p53_p3 = scmp.ne.s32.totalorder %s15_s7, %s52_s15  ;;  %p58_p5 = scmp.lt.s32.totalorder %s52_s15, %s52_s15 }
   0xb   :  { %p59_p6 = por %p58_p5, %p57_p4 }
   0xd   :  { %p60_p7 = pnand %p59_p6, %p53_p3 }
   0xf   :  { %63 = shalt.err (!%p60_p7)
}
  0x10   :  { %17 = dma.hbm_to_vmem [thread:$0]  %s126_s0, 256, %s15_s7, [#allocation3]  }
  0x11   :  { %86 = dma.done.wait [#allocation3], 256  }
  0x12   :  { %87 = vsyncadd [#allocation3], 4294967040  ;;  %s91_s18 = smov [#allocation5]   ;;  %v21_v0 = vld [vmem:[#allocation2] sm:$0xff]  ;;  %v22_v1 = vld [vmem:[#allocation2 + $0x8] sm:$0xff] }
  0x13   :  { %s31_s19 = sshll.u32 %s91_s18, 4  ;;  %23 = vst [vmem:[#allocation5] sm:$0xff] %v21_v0  ;;  %24 = vst [vmem:[#allocation5 + $0x8] sm:$0xff] %v22_v1  ;;  %s32_s19 = int_to_ptr.vmem [resolvable:$true] %s31_s19 }
  0x14   :  { %s64_s20 = scalar_lea.vmem %s32_s19, 256  ;;  %p69_p9 = scmp.lt.s32.totalorder %s32_s19, %s32_s19 }
  0x15   :  { %p65_p8 = scmp.ne.s32.totalorder %s32_s19, %s64_s20  ;;  %p70_p10 = scmp.lt.s32.totalorder %s64_s20, %s64_s20 }
  0x17   :  { %p71_p11 = por %p70_p10, %p69_p9 }
  0x19   :  { %p72_p12 = pnand %p71_p11, %p65_p8 }
  0x1b   :  { %75 = shalt.err (!%p72_p12)
}
  0x1c   :  { %s76_s0 = scalar_lea.hbm %s127_s1, 256 }
  0x1d   :  { %p77_p13 = scmp.ne.s32.totalorder %s127_s1, %s76_s0  ;;  %p80_p0 = scmp.lt.u32.totalorder %s76_s0, %s127_s1 }
  0x1f   :  { %p82_p1 = pnand %p80_p0, %p77_p13 }
  0x21   :  { %85 = shalt.err (!%p82_p1)
}
  0x22   :  { %34 = dma.vmem_to_hbm [thread:$0]  %s32_s19, 256, %s127_s1, [#allocation4]  }
  0x23   :  { %88 = dma.done.wait [#allocation4], 256  }
  0x24   :  { %89 = vsyncadd [#allocation4], 4294967040 }
  0x25   :  { %38 = vsyncpa [#allocation3], 1 }
  0x26   :  { %39 = vsyncpa [#allocation4], 1 }

</bundles_post_ra>
